<compile_context>
chip_gen: v5e
topology: v5e:2x2
jax: 0.10.0
libtpu: 0.0.40
codegen_flags: <defaults>
</compile_context>

<pallas_src>
import jax
import jax.numpy as jnp
from jax.experimental import pallas as pl
from jax.experimental.pallas import tpu as pltpu


def _diva_kernel(x_ref, s_ref, sht_ref, swt_ref, w_ref, b_ref, o_ref):
    """Fused DiVA attention for one batch element (one grid step).

    x_ref   : (C, H*W)    rows are channels, lanes are h*W + w
    s_ref   : (H*W, H+W)  fused reduce selector, cols 0:H = row-mean/W, cols H: = col-mean/H
    sht_ref : (H+W, H*W)  row-broadcast selector, rows H: are zero
    swt_ref : (H+W, H*W)  col-broadcast selector, rows :H are zero
    w_ref   : (2C, C)     stacked 1x1-conv weights [Wh ; Ww]
    b_ref   : (2C, 1)     stacked biases [bh ; bw]
    o_ref   : (C, H*W)
    """
    x = x_ref[...]                                    # (C, HW)
    C = x.shape[0]

    # --- single fused reduction matmul (MXU-native orientation) -------------------
    # rows 0:C  -> per-(c) means   (cols 0:H over width, cols H: over height)
    # rows C:2C -> per-(c) E[x^2]  (same column layout)
    xx = jnp.concatenate([x, x * x], axis=0)          # (2C, HW)
    r = jnp.dot(xx, s_ref[...], preferred_element_type=jnp.float32)   # (2C, H+W)

    mean = r[:C, :]                                   # (C, H+W)  sublane-aligned slice
    var = r[C:, :] - mean * mean                      # one-pass variance, (C, H+W)

    # --- fused 1x1 convs (channel mixing) + sigmoid --------------------------------
    # rows 0:C of `a` = sigmoid(Wh @ var + bh), rows C:2C = sigmoid(Ww @ var + bw).
    a = jax.nn.sigmoid(
        jnp.dot(w_ref[...], var, preferred_element_type=jnp.float32) + b_ref[...]
    )                                                 # (2C, H+W)

    # --- broadcast gates back to lane-dense (C, HW) and modulate x -----------------
    # The zero-padded selector rows kill the unwanted column blocks of `a`, so only
    # sublane-aligned row slices are needed here.
    gate_h = jnp.dot(a[:C, :], sht_ref[...], preferred_element_type=jnp.float32)
    gate_w = jnp.dot(a[C:, :], swt_ref[...], preferred_element_type=jnp.float32)
    o_ref[...] = x * (gate_h * gate_w)


def diva_forward_nchw(x, Wh, bh, Ww, bw, kernel_size=1):
    """x: (N, C, H, W) float32; Wh/Ww: (C, C) 1x1-conv weights; bh/bw: (C,) biases."""
    assert kernel_size == 1, (
        "DiVA_attention's Conv2d(padding=0) only admits kernel_size=1 on the "
        "(H,1)/(1,W) contrast maps; larger kernels are invalid in the original module.")
    N, C, H, W = x.shape
    HW = H * W

    x2 = x.reshape(N * C, HW)                         # free reshape (NCHW is contiguous)

    hw = jnp.arange(HW)
    row = hw // W                                     # h index of each flat position
    col = hw % W                                      # w index of each flat position

    # Fused reduce selector (scale folded in so the matmul yields means directly).
    sh = (row[:, None] == jnp.arange(H)[None, :]).astype(jnp.float32) / W   # (HW, H)
    sw = (col[:, None] == jnp.arange(W)[None, :]).astype(jnp.float32) / H   # (HW, W)
    s = jnp.concatenate([sh, sw], axis=1)                                   # (HW, H+W)

    # Zero-padded broadcast selectors (so the kernel only takes row slices of `a`).
    sht_big = jnp.concatenate(
        [(jnp.arange(H)[:, None] == row[None, :]).astype(jnp.float32),
         jnp.zeros((W, HW), jnp.float32)], axis=0)                          # (H+W, HW)
    swt_big = jnp.concatenate(
        [jnp.zeros((H, HW), jnp.float32),
         (jnp.arange(W)[:, None] == col[None, :]).astype(jnp.float32)], axis=0)

    # Stacked conv weights / biases (no kron; shared across all grid steps).
    w_cat = jnp.concatenate([Wh, Ww], axis=0)                               # (2C, C)
    b_cat = jnp.concatenate([bh, bw], axis=0).reshape(2 * C, 1)             # (2C, 1)

    # One grid step per batch element; weights/selectors use constant index_maps so they
    # stay VMEM-resident across steps.  For much larger shapes, raise vmem_limit_bytes in
    # CompilerParams (v6e 32 MiB / v5e 16 MiB scoped defaults) rather than shrinking tiles.
    out = pl.pallas_call(
        _diva_kernel,
        out_shape=jax.ShapeDtypeStruct((N * C, HW), jnp.float32),
        grid_spec=pltpu.PrefetchScalarGridSpec(
            num_scalar_prefetch=0,
            grid=(N,),
            in_specs=[
                pl.BlockSpec((C, HW), lambda n: (n, 0)),        # per-batch x tile
                pl.BlockSpec(s.shape, lambda n: (0, 0)),        # constants: resident
                pl.BlockSpec(sht_big.shape, lambda n: (0, 0)),
                pl.BlockSpec(swt_big.shape, lambda n: (0, 0)),
                pl.BlockSpec(w_cat.shape, lambda n: (0, 0)),
                pl.BlockSpec(b_cat.shape, lambda n: (0, 0)),
            ],
            out_specs=pl.BlockSpec((C, HW), lambda n: (n, 0)),
        ),
        compiler_params=pltpu.CompilerParams(
            dimension_semantics=("parallel",)),                 # batch steps shard across TCs
    )(x2, s, sht_big, swt_big, w_cat, b_cat)

    return out.reshape(N, C, H, W)


def diva_reference_nchw(x, Wh, bh, Ww, bw):
    """Pure-JAX reference mirroring the PyTorch module (two-pass variance)."""
    mean_h = jnp.mean(x, axis=3, keepdims=True)
    var_h = jnp.mean((x - mean_h) ** 2, axis=3, keepdims=True)          # (N, C, H, 1)
    mean_w = jnp.mean(x, axis=2, keepdims=True)
    var_w = jnp.mean((x - mean_w) ** 2, axis=2, keepdims=True)          # (N, C, 1, W)
    a_h = jax.nn.sigmoid(jnp.einsum('oc,nchw->nohw', Wh, var_h)
                         + bh[None, :, None, None])
    a_w = jax.nn.sigmoid(jnp.einsum('oc,nchw->nohw', Ww, var_w)
                         + bw[None, :, None, None])
    return x * a_w * a_h


if __name__ == "__main__":
    # Small shapes consistent with the module: N=2, n_feat=8, 16x16 spatial, kernel_size=1.
    N, C, H, W = 2, 8, 16, 16
    K = 1   # only valid kernel_size for this module (see note at top)

    key = jax.random.PRNGKey(0)
    kx, k1, k2, k3, k4 = jax.random.split(key, 5)
    x = jax.random.normal(kx, (N, C, H, W), jnp.float32)              # PyTorch NCHW layout
    Wh = 0.1 * jax.random.normal(k1, (C, C), jnp.float32)             # conv_h.weight[:, :, 0, 0]
    bh = 0.1 * jax.random.normal(k2, (C,), jnp.float32)
    Ww = 0.1 * jax.random.normal(k3, (C, C), jnp.float32)             # conv_w.weight[:, :, 0, 0]
    bw = 0.1 * jax.random.normal(k4, (C,), jnp.float32)

    out = diva_forward_nchw(x, Wh, bh, Ww, bw, kernel_size=K)
    out = jax.block_until_ready(out)

    ref = diva_reference_nchw(x, Wh, bh, Ww, bw)
    assert out.shape == (N, C, H, W)
    max_err = jnp.max(jnp.abs(out - ref))
    assert jnp.allclose(out, ref, rtol=1e-4, atol=1e-4), f"max abs err = {max_err}"

    print("KERNEL_OK")
</pallas_src>

<mosaic_0001>
module attributes {stable_mosaic.version = 11 : i64} {
  func.func @_diva_kernel(%arg0: i32, %arg1: memref<8x256xf32, #tpu.memory_space<vmem>>, %arg2: memref<256x32xf32, #tpu.memory_space<vmem>>, %arg3: memref<32x256xf32, #tpu.memory_space<vmem>>, %arg4: memref<32x256xf32, #tpu.memory_space<vmem>>, %arg5: memref<16x8xf32, #tpu.memory_space<vmem>>, %arg6: memref<16x1xf32, #tpu.memory_space<vmem>>, %arg7: memref<8x256xf32, #tpu.memory_space<vmem>>) attributes {dimension_semantics = [#tpu.dimension_semantics<parallel>], iteration_bounds = array<i64: 2>, scalar_prefetch = 0 : i64, scratch_operands = 0 : i64, tpu.core_type = #tpu.core_type<tc>, window_params = [{transform_indices = @transform_0, window_bounds = array<i64: 8, 256>}, {pipeline_mode = #tpu.pipeline_mode<synchronous>, transform_indices = @transform_1, window_bounds = array<i64: 256, 32>}, {pipeline_mode = #tpu.pipeline_mode<synchronous>, transform_indices = @transform_2, window_bounds = array<i64: 32, 256>}, {pipeline_mode = #tpu.pipeline_mode<synchronous>, transform_indices = @transform_3, window_bounds = array<i64: 32, 256>}, {pipeline_mode = #tpu.pipeline_mode<synchronous>, transform_indices = @transform_4, window_bounds = array<i64: 16, 8>}, {pipeline_mode = #tpu.pipeline_mode<synchronous>, transform_indices = @transform_5, window_bounds = array<i64: 16, 1>}, {transform_indices = @transform_6, window_bounds = array<i64: 8, 256>}]} {
    %c0 = arith.constant 0 : index
    %c0_0 = arith.constant 0 : index
    %0 = vector.load %arg1[%c0, %c0_0] : memref<8x256xf32, #tpu.memory_space<vmem>>, vector<8x256xf32>
    %1 = arith.mulf %0, %0 : vector<8x256xf32>
    %2 = tpu.concatenate %0, %1 in 0 : vector<8x256xf32>, vector<8x256xf32> -> vector<16x256xf32>
    %c0_1 = arith.constant 0 : index
    %c0_2 = arith.constant 0 : index
    %3 = vector.load %arg2[%c0_1, %c0_2] : memref<256x32xf32, #tpu.memory_space<vmem>>, vector<256x32xf32>
    %cst = arith.constant dense<0.000000e+00> : vector<16x32xf32>
    %4 = tpu.matmul %2, %3, %cst {dimension_numbers = #tpu.dot_dimension_numbers<[1], [0], [0], [1], [0, 0, 1, 1], [], []>} : vector<16x256xf32>, vector<256x32xf32>, vector<16x32xf32> -> vector<16x32xf32>
    %5 = vector.extract_strided_slice %4 {offsets = [0, 0], sizes = [8, 32], strides = [1, 1]} : vector<16x32xf32> to vector<8x32xf32>
    %6 = vector.extract_strided_slice %4 {offsets = [8, 0], sizes = [8, 32], strides = [1, 1]} : vector<16x32xf32> to vector<8x32xf32>
    %7 = arith.mulf %5, %5 : vector<8x32xf32>
    %8 = arith.subf %6, %7 : vector<8x32xf32>
    %c0_3 = arith.constant 0 : index
    %c0_4 = arith.constant 0 : index
    %9 = vector.load %arg5[%c0_3, %c0_4] : memref<16x8xf32, #tpu.memory_space<vmem>>, vector<16x8xf32>
    %cst_5 = arith.constant dense<0.000000e+00> : vector<16x32xf32>
    %10 = tpu.matmul %9, %8, %cst_5 {dimension_numbers = #tpu.dot_dimension_numbers<[1], [0], [0], [1], [0, 0, 1, 1], [], []>} : vector<16x8xf32>, vector<8x32xf32>, vector<16x32xf32> -> vector<16x32xf32>
    %c0_6 = arith.constant 0 : index
    %c0_7 = arith.constant 0 : index
    %11 = vector.load %arg6[%c0_6, %c0_7] : memref<16x1xf32, #tpu.memory_space<vmem>>, vector<16x1xf32>
    %12 = vector.broadcast %11 : vector<16x1xf32> to vector<16x32xf32>
    %13 = arith.addf %10, %12 : vector<16x32xf32>
    %14 = arith.negf %13 : vector<16x32xf32>
    %15 = math.exp %14 : vector<16x32xf32>
    %cst_8 = arith.constant 1.000000e+00 : f32
    %16 = vector.broadcast %cst_8 : f32 to vector<16x32xf32>
    %17 = arith.addf %16, %15 : vector<16x32xf32>
    %18 = arith.divf %16, %17 : vector<16x32xf32>
    %19 = vector.extract_strided_slice %18 {offsets = [0, 0], sizes = [8, 32], strides = [1, 1]} : vector<16x32xf32> to vector<8x32xf32>
    %c0_9 = arith.constant 0 : index
    %c0_10 = arith.constant 0 : index
    %20 = vector.load %arg3[%c0_9, %c0_10] : memref<32x256xf32, #tpu.memory_space<vmem>>, vector<32x256xf32>
    %cst_11 = arith.constant dense<0.000000e+00> : vector<8x256xf32>
    %21 = tpu.matmul %19, %20, %cst_11 {dimension_numbers = #tpu.dot_dimension_numbers<[1], [0], [0], [1], [0, 0, 1, 1], [], []>} : vector<8x32xf32>, vector<32x256xf32>, vector<8x256xf32> -> vector<8x256xf32>
    %22 = vector.extract_strided_slice %18 {offsets = [8, 0], sizes = [8, 32], strides = [1, 1]} : vector<16x32xf32> to vector<8x32xf32>
    %c0_12 = arith.constant 0 : index
    %c0_13 = arith.constant 0 : index
    %23 = vector.load %arg4[%c0_12, %c0_13] : memref<32x256xf32, #tpu.memory_space<vmem>>, vector<32x256xf32>
    %cst_14 = arith.constant dense<0.000000e+00> : vector<8x256xf32>
    %24 = tpu.matmul %22, %23, %cst_14 {dimension_numbers = #tpu.dot_dimension_numbers<[1], [0], [0], [1], [0, 0, 1, 1], [], []>} : vector<8x32xf32>, vector<32x256xf32>, vector<8x256xf32> -> vector<8x256xf32>
    %25 = arith.mulf %21, %24 : vector<8x256xf32>
    %26 = arith.mulf %0, %25 : vector<8x256xf32>
    %c0_15 = arith.constant 0 : index
    %c0_16 = arith.constant 0 : index
    %27 = vector.load %arg7[%c0_15, %c0_16] : memref<8x256xf32, #tpu.memory_space<vmem>>, vector<8x256xf32>
    tpu.vector_store %arg7[%c0_15, %c0_16], %26 {strides = array<i32>} : memref<8x256xf32, #tpu.memory_space<vmem>>, vector<8x256xf32>,
    return
  }
  func.func @transform_0(%arg0: i32) -> (i32, i32) {
    %c0_i32 = arith.constant 0 : i32
    %c0_i32_0 = arith.constant 0 : i32
    return %arg0, %c0_i32 : i32, i32
  }
  func.func @transform_1(%arg0: i32) -> (i32, i32) {
    %c0_i32 = arith.constant 0 : i32
    %c0_i32_0 = arith.constant 0 : i32
    %c0_i32_1 = arith.constant 0 : i32
    return %c0_i32, %c0_i32_0 : i32, i32
  }
  func.func @transform_2(%arg0: i32) -> (i32, i32) {
    %c0_i32 = arith.constant 0 : i32
    %c0_i32_0 = arith.constant 0 : i32
    %c0_i32_1 = arith.constant 0 : i32
    return %c0_i32, %c0_i32_0 : i32, i32
  }
  func.func @transform_3(%arg0: i32) -> (i32, i32) {
    %c0_i32 = arith.constant 0 : i32
    %c0_i32_0 = arith.constant 0 : i32
    %c0_i32_1 = arith.constant 0 : i32
    return %c0_i32, %c0_i32_0 : i32, i32
  }
  func.func @transform_4(%arg0: i32) -> (i32, i32) {
    %c0_i32 = arith.constant 0 : i32
    %c0_i32_0 = arith.constant 0 : i32
    %c0_i32_1 = arith.constant 0 : i32
    return %c0_i32, %c0_i32_0 : i32, i32
  }
  func.func @transform_5(%arg0: i32) -> (i32, i32) {
    %c0_i32 = arith.constant 0 : i32
    %c0_i32_0 = arith.constant 0 : i32
    %c0_i32_1 = arith.constant 0 : i32
    return %c0_i32, %c0_i32_0 : i32, i32
  }
  func.func @transform_6(%arg0: i32) -> (i32, i32) {
    %c0_i32 = arith.constant 0 : i32
    %c0_i32_0 = arith.constant 0 : i32
    return %arg0, %c0_i32 : i32, i32
  }
}

</mosaic_0001>

<bundles_post_ra>
// kernel: tpu_custom_call.1
= control target key start
LH: loop header
LB: loop body
LE: loop exit
PB: predicated region body
PF: predicated region fallthrough
CT: control target
= control target key end

     0   :  { %11 = vsyncpa [#allocation3], 0  ;;  %s1029_s0 = inlined_call_operand.vmem [shape: f32[16,256], index: 0, kind: input, shape index: {}]   ;;  %s1030_s1 = inlined_call_operand.vmem [shape: f32[256,32], index: 1, kind: input, shape index: {}]   ;;  %s1031_s2 = inlined_call_operand.vmem [shape: f32[32,256], index: 2, kind: input, shape index: {}]   ;;  %s1032_s3 = inlined_call_operand.vmem [shape: f32[32,256], index: 3, kind: input, shape index: {}]   ;;  %s1033_s4 = inlined_call_operand.vmem [shape: f32[16,8], index: 4, kind: input, shape index: {}]   ;;  %s1034_s5 = inlined_call_operand.vmem [shape: f32[16,1], index: 5, kind: input, shape index: {}]   ;;  %s1035_s6 = inlined_call_operand.hbm [shape: f32[16,256], index: 6, kind: output, shape index: {}]  }
   0x1   :  { %13 = vsyncpa [#allocation3 + $0x1], 0  ;;  %s772_s21 = smov 0   ;;  %s774_s22 = smov 0  }
   0x2   :  { %s776_s23 = smov 0   ;;  %s778_s24 = smov 0  }
   0x3 LB: > { %s793_s25 = sadd.s32 4294967295, %s734_s24   ;;  %s601_s26 = sadd.s32 4294967294, %s734_s24   ;;  %s734_s24 = sphi %s778_s24, %s1041_s24   ;;  %s730_s23 = sphi %s776_s23, %s1040_s23   ;;  %s726_s22 = sphi %s774_s22, %s1039_s22   ;;  %s722_s21 = sphi %s772_s21, %s1038_s21  }
   0x4   : > { %s797_s27 = sadd.s32 1, %s734_s24   ;;  %s157_s28 = sadd.s32 1, %s730_s23 }
   0x5   : > { %s154_s29 = ssub.s32 %s734_s24, %s797_s27  ;;  %p167_p0 = scmp.ne.s32.totalorder %s730_s23, %s726_s22 }
   0x6   : > { %p155_p1 = scmp.eq.s32.totalorder %s154_s29, 0  ;;  %p168_p2 = scmp.eq.s32.totalorder %s793_s25, 1 }
   0x7   : > { %p173_p3 = scmp.ne.s32.totalorder %s726_s22, %s722_s21  ;;  %p174_p4 = scmp.eq.s32.totalorder %s601_s26, 1 }
   0x8   : > { %s808_s30 = scalar_select %p155_p1, %s730_s23, %s157_s28  }
   0x9   : > { %p810_p5 = por %p168_p2, %p167_p0  ;;  %p814_p6 = por %p174_p4, %p173_p3 }
   0xa   : > { %p604_p7 = scmp.ge.s32.totalorder %s734_s24, 1  ;;  %p215_p8 = scmp.lt.s32.totalorder %s734_s24, 3 }
   0xc   : > { %p216_p9 = pnand %p604_p7, %p215_p8 }
   0xd   : > { %p245_p10 = scmp.lt.s32.totalorder (!%p216_p9), %s793_s25, 1  ;;  %s622_s15 = sshll.u32 (!%p216_p9), %s793_s25, 4 }
   0xe   : > { %219 = sbr.rel (%p216_p9) target bundleno = 508 (0x1fc), region = 44  ;;  %s537_s19 = scalar_lea.hbm (!%p216_p9), %s1035_s6, %s622_s15 }
   0xf   : > { %s541_s26 = sshll.u32 (!%p216_p9), %s537_s19, 4  ;;  %s692_s12 = scalar_lea.hbm (!%p216_p9), %s1035_s6, 32  ;;  %s542_s26 = int_to_ptr.hbm [resolvable:$true] %s541_s26 }
  0x13   : > { %v269_v0 = vld [vmem:[%s1030_s1 + $0x78] sm:$0xff]  ;;  %v268_v2 = vld [vmem:[%s1030_s1 + $0x70] sm:$0xff]  ;;  %v267_v4 = vld [vmem:[%s1030_s1 + $0x68] sm:$0xff]  ;;  %s246_s29 = scalar_select %p245_p10, %s793_s25, 1  ;;  %v736_v36 = vmov 0   ;;  %vm348_vm0 = vcmask 64512  }
  0x14   : > { %v285_v1 = vld [vmem:[%s1030_s1 + $0xf8] sm:$0xff]  ;;  %286 = vmatpush.msra.mxu0 %v269_v0  ;;  %v284_v3 = vld [vmem:[%s1030_s1 + $0xf0] sm:$0xff]  ;;  %v283_v5 = vld [vmem:[%s1030_s1 + $0xe8] sm:$0xff]  ;;  %663 = vset.pattern.permute.xlu0 %v736_v36  ;;  %vm424_vm4 = vcmask 261120   ;;  %s686_s25 = sshra.s32 %s542_s26, 4  ;;  %s687_s25 = int_to_ptr.hbm [resolvable:$true] %s686_s25 }
  0x15   : > { %309 = vmatpush.msra.mxu1 %v285_v1  ;;  %v266_v6 = vld [vmem:[%s1030_s1 + $0x60] sm:$0xff]  ;;  %v265_v8 = vld [vmem:[%s1030_s1 + $0x58] sm:$0xff]  ;;  %v264_v10 = vld [vmem:[%s1030_s1 + $0x50] sm:$0xff]  ;;  %s621_s17 = sshll.u32 %s246_s29, 4  ;;  %s688_s9 = scalar_lea.hbm %s687_s25, 16 }
  0x16   : > { %287 = vmatpush.msra.mxu0 %v268_v2  ;;  %v282_v7 = vld [vmem:[%s1030_s1 + $0xe0] sm:$0xff]  ;;  %v281_v9 = vld [vmem:[%s1030_s1 + $0xd8] sm:$0xff]  ;;  %v280_v11 = vld [vmem:[%s1030_s1 + $0xd0] sm:$0xff]  ;;  %s249_s13 = scalar_lea.vmem %s1029_s0, %s621_s17  ;;  %p689_p11 = scmp.ne.s32.totalorder %s687_s25, %s688_s9 }
  0x17   : > { %310 = vmatpush.msra.mxu1 %v284_v3  ;;  %v263_v12 = vld [vmem:[%s1030_s1 + $0x48] sm:$0xff]  ;;  %v262_v14 = vld [vmem:[%s1030_s1 + $0x40] sm:$0xff]  ;;  %v261_v16 = vld [vmem:[%s1030_s1 + $0x38] sm:$0xff]  ;;  %p693_p0 = scmp.lt.s32.totalorder %s687_s25, %s1035_s6  ;;  %p694_p1 = scmp.lt.s32.totalorder %s692_s12, %s688_s9 }
  0x18   : > { %288 = vmatpush.msra.mxu0 %v267_v4  ;;  %v279_v13 = vld [vmem:[%s1030_s1 + $0xc8] sm:$0xff]  ;;  %v278_v15 = vld [vmem:[%s1030_s1 + $0xc0] sm:$0xff]  ;;  %v277_v17 = vld [vmem:[%s1030_s1 + $0xb8] sm:$0xff]  ;;  %p690_p12 = pnand %p689_p11, %p810_p5 }
  0x19   : > { %311 = vmatpush.msra.mxu1 %v283_v5  ;;  %v260_v18 = vld [vmem:[%s1030_s1 + $0x30] sm:$0xff]  ;;  %v259_v20 = vld [vmem:[%s1030_s1 + $0x28] sm:$0xff]  ;;  %v258_v22 = vld [vmem:[%s1030_s1 + $0x20] sm:$0xff]  ;;  %p695_p2 = por %p694_p1, %p693_p0 }
  0x1a   : > { %289 = vmatpush.msra.mxu0 %v266_v6  ;;  %v276_v19 = vld [vmem:[%s1030_s1 + $0xb0] sm:$0xff]  ;;  %v275_v21 = vld [vmem:[%s1030_s1 + $0xa8] sm:$0xff]  ;;  %v274_v23 = vld [vmem:[%s1030_s1 + $0xa0] sm:$0xff]  ;;  %p691_p13 = pneg %p690_p12 }
  0x1b   : > { %312 = vmatpush.msra.mxu1 %v282_v7  ;;  %v257_v24 = vld [vmem:[%s1030_s1 + $0x18] sm:$0xff]  ;;  %v256_v26 = vld [vmem:[%s1030_s1 + $0x10] sm:$0xff]  ;;  %v255_v28 = vld [vmem:[%s1030_s1 + $0x8] sm:$0xff] }
  0x1c   : > { %290 = vmatpush.msra.mxu0 %v265_v8  ;;  %v273_v25 = vld [vmem:[%s1030_s1 + $0x98] sm:$0xff]  ;;  %v272_v27 = vld [vmem:[%s1030_s1 + $0x90] sm:$0xff]  ;;  %v271_v29 = vld [vmem:[%s1030_s1 + $0x88] sm:$0xff]  ;;  %p696_p3 = pnand %p695_p2, %p691_p13 }
  0x1d   : > { %313 = vmatpush.msra.mxu1 %v281_v9  ;;  %v254_v30 = vld [vmem:[%s1030_s1] sm:$0xff]  ;;  %v923_v33 = vld [vmem:[%s249_s13 + $0x8] sm:$0xff]  ;;  %v422_v49 = vld [vmem:[%s1031_s2 + $0x30] sm:$0xff] }
  0x1e   : > { %291 = vmatpush.msra.mxu0 %v264_v10  ;;  %v270_v31 = vld [vmem:[%s1030_s1 + $0x80] sm:$0xff]  ;;  %v253_v35 = vmul.f32 %v923_v33, %v923_v33  ;;  %v337_v38 = vld [vmem:[%s1034_s5 + $0x8] sm:$0xff]  ;;  %440 = vmatpush.msra.mxu3 %v422_v49  ;;  %v418_v51 = vld [vmem:[%s1031_s2 + $0x10] sm:$0xff] }
  0x1f   : > { %314 = vmatpush.msra.mxu1 %v280_v11  ;;  %v921_v32 = vld [vmem:[%s249_s13] sm:$0xff]  ;;  %v335_v48 = vld [vmem:[%s1033_s4 + $0x8] sm:$0xff]  ;;  %v423_v54 = vld [vmem:[%s1031_s2 + $0x38] sm:$0xff]  ;;  %s242_s13 = sand.u32 1, %s726_s22  }
  0x20   : > { %292 = vmatpush.msra.mxu0 %v263_v12  ;;  %v252_v34 = vmul.f32 %v921_v32, %v921_v32  ;;  %v336_v37 = vld [vmem:[%s1034_s5] sm:$0xff]  ;;  %v474_v55 = vld [vmem:[%s1032_s3 + $0x30] sm:$0xff]  ;;  %v421_v56 = vld [vmem:[%s1031_s2 + $0x28] sm:$0xff]  ;;  %s605_s14 = sshll.u32 %s242_s13, 4  ;;  %s526_s28 = scalar_lea.sflag [#allocation3], %s242_s13 }
  0x21   : > { %315 = vmatpush.msra.mxu1 %v279_v13  ;;  %340 = vperm.xlu0 %663, %v336_v37   ;;  %v334_v47 = vld [vmem:[%s1033_s4] sm:$0xff]  ;;  %v419_v60 = vld [vmem:[%s1031_s2 + $0x18] sm:$0xff]  ;;  %v470_v61 = vld [vmem:[%s1032_s3 + $0x10] sm:$0xff]  ;;  %s244_s16 = scalar_lea.vmem [#allocation2], %s605_s14 }
  0x22   : > { %293 = vmatpush.msra.mxu0 %v262_v14  ;;  %v420_v50 = vld [vmem:[%s1031_s2 + $0x20] sm:$0xff]  ;;  %v417_v63 = vld [vmem:[%s1031_s2 + $0x8] sm:$0xff]  ;;  %s539_s20 = sshll.u32 %s244_s16, 4  ;;  %s540_s20 = int_to_ptr.vmem [resolvable:$true] %s539_s20 }
  0x23   : > { %316 = vmatpush.msra.mxu1 %v278_v15  ;;  %441 = vmatpush.msra.mxu3 %v420_v50  ;;  %v416_v52 = vld [vmem:[%s1031_s2] sm:$0xff] }
  0x24   : > { %294 = vmatpush.msra.mxu0 %v261_v16  ;;  %v472_v58 = vld [vmem:[%s1032_s3 + $0x20] sm:$0xff] }
  0x25   : > { %317 = vmatpush.msra.mxu1 %v277_v17  ;;  %442 = vmatpush.msra.mxu3 %v418_v51  ;;  %v468_v0 = vld [vmem:[%s1032_s3] sm:$0xff] }
  0x26   : > { %295 = vmatpush.msra.mxu0 %v260_v18 }
  0x27   : > { %318 = vmatpush.msra.mxu1 %v276_v19  ;;  %443 = vmatpush.msra.mxu3 %v416_v52 }
  0x28   : > { %296 = vmatpush.msra.mxu0 %v259_v20  ;;  %v475_v20 = vld [vmem:[%s1032_s3 + $0x38] sm:$0xff] }
  0x29   : > { %319 = vmatpush.msra.mxu1 %v275_v21  ;;  %345 = vperm.xlu0 %663, %v337_v38  }
  0x2a   : > { %297 = vmatpush.msra.mxu0 %v258_v22  ;;  %460 = vmatpush.msrb.mxu3 %v423_v54 }
  0x2b   : > { %320 = vmatpush.msra.mxu1 %v274_v23  ;;  %v473_v23 = vld [vmem:[%s1032_s3 + $0x28] sm:$0xff] }
  0x2c   : > { %298 = vmatpush.msra.mxu0 %v257_v24  ;;  %461 = vmatpush.msrb.mxu3 %v421_v56 }
  0x2d   : > { %321 = vmatpush.msra.mxu1 %v273_v25 }
  0x2e   : > { %299 = vmatpush.msra.mxu0 %v256_v26  ;;  %462 = vmatpush.msrb.mxu3 %v419_v60 }
  0x2f   : > { %322 = vmatpush.msra.mxu1 %v272_v27  ;;  %v471_v27 = vld [vmem:[%s1032_s3 + $0x18] sm:$0xff] }
  0x30   : > { %300 = vmatpush.msra.mxu0 %v255_v28  ;;  %463 = vmatpush.msrb.mxu3 %v417_v63 }
  0x31   : > { %323 = vmatpush.msra.mxu1 %v271_v29  ;;  %v469_v29 = vld [vmem:[%s1032_s3 + $0x8] sm:$0xff] }
  0x32   : > { %301 = vmatpush.msra.mxu0 %v254_v30 }
  0x33   : > { %324 = vmatpush.msra.mxu1 %v270_v31  ;;  %302 = vmatmul.f32.vlgmr.msra.gmra.mxu0 %v921_v32 }
  0x34   : > { %325 = vmatmul.f32.vlgmr.msra.gmra.mxu1 %v923_v33 }
  0x3b   : > { %305 = vmatmul.f32.gmra.mxu0 %v252_v34 }
  0x3c   : > { %328 = vmatmul.f32.gmra.mxu1 %v253_v35 }
  0x93   : > { %v341_v53 = vpop.permute.xlu0 %340 }
  0x9b   : > { %v346_v1 = vpop.permute.xlu0 %345 }
  0xb0   : > { %v303_v39 = vpop.f32.mrf.mxu0 }
  0xb1   : > { %v326_v40 = vpop.f32.mrf.mxu1 }
  0xb2   : > { %v327_v41 = vadd.f32 %v326_v40, %v303_v39 }
  0xb4   : > { %v332_v44 = vmul.f32 %v327_v41, %v327_v41 }
  0xb8   : > { %v306_v42 = vpop.f32.mrf.mxu0 }
  0xb9   : > { %v329_v43 = vpop.f32.mrf.mxu1 }
  0xba   : > { %v330_v45 = vadd.f32 %v329_v43, %v306_v42 }
  0xbc   : > { %v333_v46 = vsub.f32 %v330_v45, %v332_v44 }
  0xbe   : > { %370 = vmatpush.msra.mxu2 %v333_v46 }
  0xbf   : > { %608 = vmatmul.msk.f32.vlgmr.msra.gmra.mxu2 %vm348_vm0, %v334_v47 }
  0xc0   : > { %491 = vmatpush.msrb.mxu2 %v474_v55 }
  0xc2   : > { %492 = vmatpush.msrb.mxu2 %v472_v58 }
  0xc4   : > { %493 = vmatpush.msrb.mxu2 %v470_v61 }
  0xc6   : > { %494 = vmatpush.msrb.mxu2 %v468_v0 }
  0xc7   : > { %609 = vmatmul.msk.f32.gmra.mxu2 %vm348_vm0, %v335_v48 }
 0x142   : > { %v372_v57 = vpop.f32.mrf.mxu2 }
 0x143   : > { %v373_v59 = vadd.f32 %v372_v57, %v341_v53 }
 0x145   : > { %v610_v62 = vmul.f32 -1.442695, %v373_v59 }
 0x147   : > { %664 = vpow2.f32 %v610_v62 }
 0x14a   : > { %v375_v2 = vpop.f32.mrf.mxu2 }
 0x14b   : > { %v376_v3 = vadd.f32 %v375_v2, %v346_v1 }
 0x14d   : > { %v665_v4 = vpop.eup %664  ;;  %v611_v5 = vmul.f32 -1.442695, %v376_v3 }
 0x14e   : > { %v384_v6 = vadd.f32 1.0, %v665_v4 }
 0x14f   : > { %666 = vpow2.f32 %v611_v5 }
 0x150   : > { %668 = vrcp.f32 %v384_v6  ;;  %v397_v12 = vand.u32 2147483648, %v384_v6  ;;  %v395_v14 = vand.u32 2147483647, %v384_v6  ;;  %vm391_vm2 = vweird.f32 %v384_v6 }
 0x152   : > { %v398_v17 = vor.u32 1.1754944e-38, %v397_v12  ;;  %vm396_vm5 = vcmp.eq.f32.partialorder %v395_v14, 8.507059e+37 }
 0x155   : > { %v667_v7 = vpop.eup %666 }
 0x156   : > { %v669_v8 = vpop.eup %668  ;;  %v385_v9 = vadd.f32 1.0, %v667_v7 }
 0x157   : > { %v387_v10 = vmul.f32 %v669_v8, %v384_v6  ;;  %vm392_vm1 = vweird.f32 %v669_v8 }
 0x158   : > { %670 = vrcp.f32 %v385_v9  ;;  %vm393_vm3 = vmor %vm391_vm2, %vm392_vm1  ;;  %v412_v24 = vand.u32 2147483648, %v385_v9  ;;  %v410_v26 = vand.u32 2147483647, %v385_v9  ;;  %vm406_vm7 = vweird.f32 %v385_v9 }
 0x159   : > { %v388_v11 = vsub.f32 1.0, %v387_v10 }
 0x15a   : > { %v413_v30 = vor.u32 1.1754944e-38, %v412_v24  ;;  %vm411_vm9 = vcmp.eq.f32.partialorder %v410_v26, 8.507059e+37 }
 0x15b   : > { %v389_v13 = vmul.f32 %v669_v8, %v388_v11 }
 0x15d   : > { %v390_v15 = vadd.f32 %v669_v8, %v389_v13 }
 0x15e   : > { %v671_v16 = vpop.eup %670 }
 0x15f   : > { %v394_v18 = vsel %vm393_vm3, %v669_v8, %v390_v15  ;;  %v402_v19 = vmul.f32 %v671_v16, %v385_v9  ;;  %vm407_vm6 = vweird.f32 %v671_v16 }
 0x160   : > { %v399_v21 = vsel %vm396_vm5, %v398_v17, %v394_v18  ;;  %vm408_vm8 = vmor %vm406_vm7, %vm407_vm6 }
 0x161   : > { %612 = vmatmul.msk.f32.vlgmr.msra.gmra.mxu3 %vm424_vm4, %v399_v21  ;;  %v403_v22 = vsub.f32 1.0, %v402_v19 }
 0x162   : > { %511 = vmatpush.msra.mxu3 %v475_v20 }
 0x163   : > { %v404_v25 = vmul.f32 %v671_v16, %v403_v22 }
 0x164   : > { %512 = vmatpush.msra.mxu3 %v473_v23 }
 0x165   : > { %v405_v28 = vadd.f32 %v671_v16, %v404_v25 }
 0x166   : > { %513 = vmatpush.msra.mxu3 %v471_v27 }
 0x167   : > { %v409_v31 = vsel %vm408_vm8, %v671_v16, %v405_v28 }
 0x168   : > { %v414_v34 = vsel %vm411_vm9, %v413_v30, %v409_v31  ;;  %514 = vmatpush.msra.mxu3 %v469_v29 }
 0x169   : > { %613 = vmatmul.msk.f32.vlgmr.msrb.gmra.mxu3 %vm424_vm4, %v399_v21  ;;  %614 = vmatmul.msk.f32.vlgmr.msrb.gmra.mxu2 %vm424_vm4, %v414_v34 }
 0x171   : > { %615 = vmatmul.msk.f32.vlgmr.msra.gmra.mxu3 %vm424_vm4, %v414_v34 }
 0x1e4   : > { %v445_v35 = vpop.f32.mrf.mxu3 }
 0x1ec   : > { %v465_v36 = vpop.f32.mrf.mxu3  ;;  %v496_v37 = vpop.f32.mrf.mxu2 }
 0x1ed   : > { %v519_v38 = vmul.f32 %v496_v37, %v445_v35 }
 0x1ef   : > { %v521_v39 = vmul.f32 %v519_v38, %v921_v32 }
 0x1f1   : > { %523 = vst [vmem:[%s244_s16] sm:$0xff] %v521_v39 }
 0x1f4   : > { %v516_v40 = vpop.f32.mrf.mxu3 }
 0x1f5   : > { %v520_v41 = vmul.f32 %v516_v40, %v465_v36 }
 0x1f7   : > { %v522_v42 = vmul.f32 %v520_v41, %v923_v33 }
 0x1f9   : > { %524 = vst [vmem:[%s244_s16 + $0x8] sm:$0xff] %v522_v42 }
 0x1fa   : > { %699 = shalt.err (!%p696_p3)
}
 0x1fb   : > { %623 = dma.vmem_to_hbm [thread:$0]  (%p810_p5), %s540_s20, 256, %s542_s26, %s526_s28  }
 0x1fc PF: > { %p629_p4 = scmp.ge.s32.totalorder %s734_s24, 2  ;;  %s553_s13 = sand.u32 1, %s722_s21  }
 0x1fd   : > { %s554_s15 = scalar_lea.sflag [#allocation3], %s553_s13 }
 0x1fe   : > { %p626_p7 = pnand %p629_p4, %p814_p6 }
 0x200   : > { %p627_p8 = pneg %p626_p7 }
 0x202   : > { %717 = dma.done.wait (%p627_p8), %s554_s15, 256  }
 0x203   : > { %719 = vsyncadd (%p627_p8), %s554_s15, 4294967040  ;;  %p16_p9 = scmp.ge.s32.totalorder %s797_s27, 4   ;;  %s1038_s21 = smov %s726_s22 }
 0x204   : > { %s1039_s22 = smov %s730_s23  ;;  %s1040_s23 = smov %s808_s30 }
 0x205   : > { %s1041_s24 = smov %s797_s27  ;;  %18 = sbr.rel (!%p16_p9) target bundleno = 3 (0x3), region = 79 }
 0x20a   :  { %560 = vsyncpa [#allocation3], 1 }
 0x20b   :  { %562 = vsyncpa [#allocation3 + $0x1], 1 }

</bundles_post_ra>
